<compile_context>
chip_gen: v7x
topology: tpu7x:2x2x1
jax: 0.10.0
libtpu: 0.0.40
codegen_flags: <defaults>
</compile_context>

<pallas_src>
import functools

import jax
import jax.numpy as jnp
from jax.experimental import pallas as pl
from jax.experimental.pallas import tpu as pltpu


# --------------------------------------------------------------------------- #
# Kernel
# --------------------------------------------------------------------------- #
def dual_output_kernel(x_ref, w1_ref, b1_ref, w2_ref, b2_ref, wh_ref, bh_ref,
                       out_ref, *, use_bf16):
    x = x_ref[...]                                                  # (TILE_B, D)

    # ---- Linear 1 (eval-mode BN already folded into w1/b1) + ReLU ----
    h = jnp.dot(x, w1_ref[...], preferred_element_type=jnp.float32) + b1_ref[...]
    h = jnp.maximum(h, 0.0)
    # Dropout -> identity (eval)

    if use_bf16:
        # Intermediate-activation cast only (cheap VPU work on v6e/v7x).
        # Keep use_bf16=False on v5e: its VPU has no bf16 and this would be
        # pure pack overhead with zero bandwidth benefit (weights are resident).
        h = h.astype(jnp.bfloat16)

    # ---- Linear 2 + ReLU ---------------------------------------------
    f = jnp.dot(h, w2_ref[...], preferred_element_type=jnp.float32) + b2_ref[...]
    f = jnp.maximum(f, 0.0)
    # Dropout -> identity (eval)

    if use_bf16:
        f = f.astype(jnp.bfloat16)

    # ---- Fused heads: [ctr | quality] in one (half, 2) matmul --------
    # (tile_b, 2) output is a masked store, but amortized over large tile_b;
    # do NOT lane-pad it (would 64x the output HBM traffic).
    out_ref[...] = (jnp.dot(f, wh_ref[...], preferred_element_type=jnp.float32)
                    + bh_ref[...])                                  # (TILE_B, 2)


# --------------------------------------------------------------------------- #
# Wrapper
# --------------------------------------------------------------------------- #
def _vmem_limit_bytes():
    """Generation-aware VMEM budget: ~3/4 of physical, capped at 96 MiB."""
    phys = 64 * 1024 * 1024  # conservative fallback (v7x physical VMEM)
    try:
        info = pltpu.get_tpu_info()
        phys = int(getattr(info, "vmem_capacity_bytes", phys))
    except Exception:
        pass
    return min((phys * 3) // 4, 96 * 1024 * 1024)


def dual_output_forward(x, fused, *, tile_b=512, use_bf16=False):
    """x: (B, D) f32.  fused: output of prepare_params().  Returns (ctr, qual)."""
    B, D = x.shape
    H = fused["w1"].shape[1]
    half = fused["w2"].shape[1]

    if use_bf16:
        # Cast x at the producer side: the HBM stream itself becomes bf16,
        # halving the dominant DMA on v6e/v7x (an in-kernel cast would not).
        x = x.astype(jnp.bfloat16)

    # Effective batch tile:
    #   * multiple of 8 (sublane granularity),
    #   * capped at ~half the batch so the grid keeps >=2 steps (v7x megacore),
    #   * no jnp.pad: grid = cdiv(B, tile); Pallas masks the partial last tile.
    cap = max(8, pl.cdiv(pl.cdiv(B, 2), 8) * 8)
    tile_b_eff = max(8, min(tile_b, cap))
    grid = (pl.cdiv(B, tile_b_eff),)

    kernel = functools.partial(dual_output_kernel, use_bf16=use_bf16)
    resident = lambda i: (0, 0)   # weights: same block every step -> no re-DMA

    out = pl.pallas_call(
        kernel,
        out_shape=jax.ShapeDtypeStruct((B, 2), jnp.float32),
        grid_spec=pltpu.PrefetchScalarGridSpec(
            num_scalar_prefetch=0,
            grid=grid,
            in_specs=[
                pl.BlockSpec((tile_b_eff, D), lambda i: (i, 0)),  # x: batch-tiled
                pl.BlockSpec((D, H), resident),                   # w1 (BN folded)
                pl.BlockSpec((1, H), resident),                   # b1 (BN folded)
                pl.BlockSpec((H, half), resident),                # w2
                pl.BlockSpec((1, half), resident),                # b2
                pl.BlockSpec((half, 2), resident),                # [wc | wq]
                pl.BlockSpec((1, 2), resident),                   # [bc | bq]
            ],
            out_specs=pl.BlockSpec((tile_b_eff, 2), lambda i: (i, 0)),
        ),
        compiler_params=pltpu.CompilerParams(
            dimension_semantics=("parallel",),        # shards over 2 TCs on v7x
            vmem_limit_bytes=_vmem_limit_bytes(),     # ~48 MiB v7x / ~96 MiB v5e,v6e
        ),
    )(x, fused["w1"], fused["b1"], fused["w2"], fused["b2"],
      fused["wh"], fused["bh"])

    return out[:, 0:1], out[:, 1:2]


# --------------------------------------------------------------------------- #
# Parameters
# --------------------------------------------------------------------------- #
def init_params(key, input_size, hidden_size):
    """Raw torch-equivalent parameters (Linear + BatchNorm1d + two heads)."""
    half = hidden_size // 2
    ks = jax.random.split(key, 8)
    scale1 = 1.0 / jnp.sqrt(input_size)
    scale2 = 1.0 / jnp.sqrt(hidden_size)
    scale3 = 1.0 / jnp.sqrt(half)
    return {
        # Linear(input_size, hidden_size)
        "w1": jax.random.uniform(ks[0], (input_size, hidden_size), jnp.float32, -scale1, scale1),
        "b1": jax.random.uniform(ks[1], (1, hidden_size), jnp.float32, -scale1, scale1),
        # BatchNorm1d(hidden_size): affine params + running stats (eval mode)
        "gamma": jnp.ones((1, hidden_size), jnp.float32),
        "beta": jnp.zeros((1, hidden_size), jnp.float32),
        "mean": jnp.zeros((1, hidden_size), jnp.float32),
        "var": jnp.ones((1, hidden_size), jnp.float32),
        # Linear(hidden_size, hidden_size // 2)
        "w2": jax.random.uniform(ks[2], (hidden_size, half), jnp.float32, -scale2, scale2),
        "b2": jax.random.uniform(ks[3], (1, half), jnp.float32, -scale2, scale2),
        # ctr_head: Linear(hidden_size // 2, 1)
        "wc": jax.random.uniform(ks[4], (half, 1), jnp.float32, -scale3, scale3),
        "bc": jax.random.uniform(ks[5], (1, 1), jnp.float32, -scale3, scale3),
        # quality_head: Linear(hidden_size // 2, 1)
        "wq": jax.random.uniform(ks[6], (half, 1), jnp.float32, -scale3, scale3),
        "bq": jax.random.uniform(ks[7], (1, 1), jnp.float32, -scale3, scale3),
    }


def prepare_params(p, *, eps=1e-5, use_bf16=False):
    """One-time transform: fold eval-mode BN into W1/b1; fuse the two heads.

    Keep `use_bf16` identical to the flag passed to dual_output_forward so
    operand precision stays consistent (and the test tolerance matches).
    """
    scale = p["gamma"] * jax.lax.rsqrt(p["var"] + jnp.float32(eps))   # (1, H)
    w1f = p["w1"] * scale                                             # (D, H)
    b1f = (p["b1"] - p["mean"]) * scale + p["beta"]                   # (1, H)
    wh = jnp.concatenate([p["wc"], p["wq"]], axis=1)                  # (half, 2)
    bh = jnp.concatenate([p["bc"], p["bq"]], axis=1)                  # (1, 2)
    wdt = jnp.bfloat16 if use_bf16 else jnp.float32
    return {
        "w1": w1f.astype(wdt),
        "b1": b1f,                       # biases stay f32 (added post-accumulate)
        "w2": p["w2"].astype(wdt),
        "b2": p["b2"],
        "wh": wh.astype(wdt),
        "bh": bh,
    }


def reference_forward(x, p):
    """Unfused f32 reference matching the PyTorch module in eval mode."""
    h = x @ p["w1"] + p["b1"]
    h = (h - p["mean"]) / jnp.sqrt(p["var"] + 1e-5) * p["gamma"] + p["beta"]
    h = jnp.maximum(h, 0.0)
    f = jnp.maximum(h @ p["w2"] + p["b2"], 0.0)
    return f @ p["wc"] + p["bc"], f @ p["wq"] + p["bq"]


# --------------------------------------------------------------------------- #
# Smoke test
# --------------------------------------------------------------------------- #
if __name__ == "__main__":
    B, INPUT_SIZE, HIDDEN = 16, 32, 32   # small shapes; hidden//2 = 16

    key = jax.random.PRNGKey(0)
    kx, kp = jax.random.split(key)
    x = jax.random.normal(kx, (B, INPUT_SIZE), jnp.float32)
    params = init_params(kp, INPUT_SIZE, HIDDEN)

    USE_BF16 = False   # set True on v6e/v7x for bandwidth at large B; keep False on v5e
    fused = prepare_params(params, use_bf16=USE_BF16)
    # tile_b=512 is the production default; it is auto-clamped to 8 here (B=16),
    # giving a 2-step grid that exercises the pipelining path.
    ctr, qual = dual_output_forward(x, fused, tile_b=512, use_bf16=USE_BF16)
    jax.block_until_ready((ctr, qual))

    ctr_ref, qual_ref = reference_forward(x, params)
    assert ctr.shape == (B, 1) and qual.shape == (B, 1)
    tol = 2e-2 if USE_BF16 else 1e-4
    assert jnp.allclose(ctr, ctr_ref, atol=tol, rtol=tol)
    assert jnp.allclose(qual, qual_ref, atol=tol, rtol=tol)

    print("KERNEL_OK")
</pallas_src>

<mosaic_0001>
module attributes {stable_mosaic.version = 11 : i64} {
  func.func @dual_output_kernel(%arg0: i32, %arg1: memref<8x32xf32, #tpu.memory_space<vmem>>, %arg2: memref<32x32xf32, #tpu.memory_space<vmem>>, %arg3: memref<1x32xf32, #tpu.memory_space<vmem>>, %arg4: memref<32x16xf32, #tpu.memory_space<vmem>>, %arg5: memref<1x16xf32, #tpu.memory_space<vmem>>, %arg6: memref<16x2xf32, #tpu.memory_space<vmem>>, %arg7: memref<1x2xf32, #tpu.memory_space<vmem>>, %arg8: memref<8x2xf32, #tpu.memory_space<vmem>>) attributes {dimension_semantics = [#tpu.dimension_semantics<parallel>], iteration_bounds = array<i64: 2>, scalar_prefetch = 0 : i64, scratch_operands = 0 : i64, tpu.core_type = #tpu.core_type<tc>, window_params = [{transform_indices = @transform_0, window_bounds = array<i64: 8, 32>}, {pipeline_mode = #tpu.pipeline_mode<synchronous>, transform_indices = @transform_1, window_bounds = array<i64: 32, 32>}, {pipeline_mode = #tpu.pipeline_mode<synchronous>, transform_indices = @transform_2, window_bounds = array<i64: 1, 32>}, {pipeline_mode = #tpu.pipeline_mode<synchronous>, transform_indices = @transform_3, window_bounds = array<i64: 32, 16>}, {pipeline_mode = #tpu.pipeline_mode<synchronous>, transform_indices = @transform_4, window_bounds = array<i64: 1, 16>}, {pipeline_mode = #tpu.pipeline_mode<synchronous>, transform_indices = @transform_5, window_bounds = array<i64: 16, 2>}, {pipeline_mode = #tpu.pipeline_mode<synchronous>, transform_indices = @transform_6, window_bounds = array<i64: 1, 2>}, {transform_indices = @transform_7, window_bounds = array<i64: 8, 2>}]} {
    %c0 = arith.constant 0 : index
    %c0_0 = arith.constant 0 : index
    %0 = vector.load %arg1[%c0, %c0_0] : memref<8x32xf32, #tpu.memory_space<vmem>>, vector<8x32xf32>
    %c0_1 = arith.constant 0 : index
    %c0_2 = arith.constant 0 : index
    %1 = vector.load %arg2[%c0_1, %c0_2] : memref<32x32xf32, #tpu.memory_space<vmem>>, vector<32x32xf32>
    %cst = arith.constant dense<0.000000e+00> : vector<8x32xf32>
    %2 = tpu.matmul %0, %1, %cst {dimension_numbers = #tpu.dot_dimension_numbers<[1], [0], [0], [1], [0, 0, 1, 1], [], []>} : vector<8x32xf32>, vector<32x32xf32>, vector<8x32xf32> -> vector<8x32xf32>
    %c0_3 = arith.constant 0 : index
    %c0_4 = arith.constant 0 : index
    %3 = vector.load %arg3[%c0_3, %c0_4] : memref<1x32xf32, #tpu.memory_space<vmem>>, vector<1x32xf32>
    %4 = vector.broadcast %3 : vector<1x32xf32> to vector<8x32xf32>
    %5 = arith.addf %2, %4 : vector<8x32xf32>
    %cst_5 = arith.constant 0.000000e+00 : f32
    %6 = vector.broadcast %cst_5 : f32 to vector<8x32xf32>
    %7 = arith.maximumf %5, %6 : vector<8x32xf32>
    %c0_6 = arith.constant 0 : index
    %c0_7 = arith.constant 0 : index
    %8 = vector.load %arg4[%c0_6, %c0_7] : memref<32x16xf32, #tpu.memory_space<vmem>>, vector<32x16xf32>
    %cst_8 = arith.constant dense<0.000000e+00> : vector<8x16xf32>
    %9 = tpu.matmul %7, %8, %cst_8 {dimension_numbers = #tpu.dot_dimension_numbers<[1], [0], [0], [1], [0, 0, 1, 1], [], []>} : vector<8x32xf32>, vector<32x16xf32>, vector<8x16xf32> -> vector<8x16xf32>
    %c0_9 = arith.constant 0 : index
    %c0_10 = arith.constant 0 : index
    %10 = vector.load %arg5[%c0_9, %c0_10] : memref<1x16xf32, #tpu.memory_space<vmem>>, vector<1x16xf32>
    %11 = vector.broadcast %10 : vector<1x16xf32> to vector<8x16xf32>
    %12 = arith.addf %9, %11 : vector<8x16xf32>
    %cst_11 = arith.constant 0.000000e+00 : f32
    %13 = vector.broadcast %cst_11 : f32 to vector<8x16xf32>
    %14 = arith.maximumf %12, %13 : vector<8x16xf32>
    %c0_12 = arith.constant 0 : index
    %c0_13 = arith.constant 0 : index
    %15 = vector.load %arg6[%c0_12, %c0_13] : memref<16x2xf32, #tpu.memory_space<vmem>>, vector<16x2xf32>
    %cst_14 = arith.constant dense<0.000000e+00> : vector<8x2xf32>
    %16 = tpu.matmul %14, %15, %cst_14 {dimension_numbers = #tpu.dot_dimension_numbers<[1], [0], [0], [1], [0, 0, 1, 1], [], []>} : vector<8x16xf32>, vector<16x2xf32>, vector<8x2xf32> -> vector<8x2xf32>
    %c0_15 = arith.constant 0 : index
    %c0_16 = arith.constant 0 : index
    %17 = vector.load %arg7[%c0_15, %c0_16] : memref<1x2xf32, #tpu.memory_space<vmem>>, vector<1x2xf32>
    %18 = vector.broadcast %17 : vector<1x2xf32> to vector<8x2xf32>
    %19 = arith.addf %16, %18 : vector<8x2xf32>
    %c0_17 = arith.constant 0 : index
    %c0_18 = arith.constant 0 : index
    %20 = vector.load %arg8[%c0_17, %c0_18] : memref<8x2xf32, #tpu.memory_space<vmem>>, vector<8x2xf32>
    tpu.vector_store %arg8[%c0_17, %c0_18], %19 {strides = array<i32>} : memref<8x2xf32, #tpu.memory_space<vmem>>, vector<8x2xf32>,
    return
  }
  func.func @transform_0(%arg0: i32) -> (i32, i32) {
    %c0_i32 = arith.constant 0 : i32
    %c0_i32_0 = arith.constant 0 : i32
    return %arg0, %c0_i32 : i32, i32
  }
  func.func @transform_1(%arg0: i32) -> (i32, i32) {
    %c0_i32 = arith.constant 0 : i32
    %c0_i32_0 = arith.constant 0 : i32
    %c0_i32_1 = arith.constant 0 : i32
    return %c0_i32, %c0_i32_0 : i32, i32
  }
  func.func @transform_2(%arg0: i32) -> (i32, i32) {
    %c0_i32 = arith.constant 0 : i32
    %c0_i32_0 = arith.constant 0 : i32
    %c0_i32_1 = arith.constant 0 : i32
    return %c0_i32, %c0_i32_0 : i32, i32
  }
  func.func @transform_3(%arg0: i32) -> (i32, i32) {
    %c0_i32 = arith.constant 0 : i32
    %c0_i32_0 = arith.constant 0 : i32
    %c0_i32_1 = arith.constant 0 : i32
    return %c0_i32, %c0_i32_0 : i32, i32
  }
  func.func @transform_4(%arg0: i32) -> (i32, i32) {
    %c0_i32 = arith.constant 0 : i32
    %c0_i32_0 = arith.constant 0 : i32
    %c0_i32_1 = arith.constant 0 : i32
    return %c0_i32, %c0_i32_0 : i32, i32
  }
  func.func @transform_5(%arg0: i32) -> (i32, i32) {
    %c0_i32 = arith.constant 0 : i32
    %c0_i32_0 = arith.constant 0 : i32
    %c0_i32_1 = arith.constant 0 : i32
    return %c0_i32, %c0_i32_0 : i32, i32
  }
  func.func @transform_6(%arg0: i32) -> (i32, i32) {
    %c0_i32 = arith.constant 0 : i32
    %c0_i32_0 = arith.constant 0 : i32
    %c0_i32_1 = arith.constant 0 : i32
    return %c0_i32, %c0_i32_0 : i32, i32
  }
  func.func @transform_7(%arg0: i32) -> (i32, i32) {
    %c0_i32 = arith.constant 0 : i32
    %c0_i32_0 = arith.constant 0 : i32
    return %arg0, %c0_i32 : i32, i32
  }
}

</mosaic_0001>

<bundles_post_ra>
// kernel: tpu_custom_call.1
= control target key start
LH: loop header
LB: loop body
LE: loop exit
PB: predicated region body
PF: predicated region fallthrough
CT: control target
= control target key end

     0   :  { %s718_s24 = smov 0   ;;  %s784_s0 = inlined_call_operand.vmem [shape: f32[16,32], index: 0, kind: input, shape index: {}]   ;;  %s785_s1 = inlined_call_operand.vmem [shape: f32[32,32], index: 1, kind: input, shape index: {}]   ;;  %s786_s2 = inlined_call_operand.vmem [shape: f32[1,32], index: 2, kind: input, shape index: {}]   ;;  %s787_s3 = inlined_call_operand.vmem [shape: f32[32,16], index: 3, kind: input, shape index: {}]   ;;  %s788_s4 = inlined_call_operand.vmem [shape: f32[1,16], index: 4, kind: input, shape index: {}]   ;;  %s789_s5 = inlined_call_operand.vmem [shape: f32[16,2], index: 5, kind: input, shape index: {}]   ;;  %s790_s6 = inlined_call_operand.vmem [shape: f32[1,2], index: 6, kind: input, shape index: {}]   ;;  %s791_s7 = inlined_call_operand.vmem [shape: f32[16,2], index: 7, kind: output, shape index: {}]  }
   0x1 LB: > { %s584_s25 = sadd.s32 4294967295, %s673_s24   ;;  %p588_p0 = scmp.ge.s32.totalorder %s673_s24, 1  ;;  %s673_s24 = sphi %s718_s24, %s17_s24  }
   0x2   : > { %p236_p1 = scmp.lt.s32.totalorder %s673_s24, 3 }
   0x4   : > { %p237_p2 = pnand %p588_p0, %p236_p1 }
   0x5   : > { %v275_v0 = vld [vmem:[%s785_s1] sm:$0xff] (!%p237_p2)  ;;  %v276_v1 = vld [vmem:[%s785_s1 + $0x8] sm:$0xff] (!%p237_p2)  ;;  %v277_v2 = vld [vmem:[%s785_s1 + $0x10] sm:$0xff] (!%p237_p2)  ;;  %v675_v3 = vmov (!%p237_p2), 0.0|0.0   ;;  %vm676_vm0 = vmmov (!%p237_p2), 0   ;;  %v677_v6 = vmov (!%p237_p2), 0.0  }
   0x6   : > { %240 = sbr.rel (%p237_p2) target bundleno = 664 (0x298), region = 48  ;;  %641 = vmatprep.subr.bf16.mxu0 (!%p237_p2), %v675_v3  ;;  %v642_v4 = vpack.c.bf16 (!%p237_p2), %v276_v1, %v275_v0  ;;  %v278_v5 = vld [vmem:[%s785_s1 + $0x18] sm:$0xff] (!%p237_p2)  ;;  %620 = vmatprep.mubr.msk.f32.mxu0 (!%p237_p2), %vm676_vm0, %v677_v6  ;;  %p266_p3 = scmp.lt.s32.totalorder (!%p237_p2), %s584_s25, 1  ;;  %v361_v7 = vld [vmem:[%s787_s3] sm:$0xff] (!%p237_p2)  ;;  %v362_v8 = vld [vmem:[%s787_s3 + $0x8] sm:$0xff] (!%p237_p2)  ;;  %vm286_vm1 = vcmask (!%p237_p2), 261120  }
   0x7   : > { %647 = vmatprep.subr.bf16.mxu1 (!%p237_p2), %v675_v3  ;;  %v648_v9 = vpack.c.bf16 (!%p237_p2), %v362_v8, %v361_v7  ;;  %631 = vmatprep.mubr.msk.f32.mxu1 (!%p237_p2), %vm676_vm0, %v677_v6  ;;  %v645_v10 = vpack.c.bf16 (!%p237_p2), %v278_v5, %v277_v2  ;;  %v363_v12 = vld [vmem:[%s787_s3 + $0x10] sm:$0xff] (!%p237_p2)  ;;  %v364_v13 = vld [vmem:[%s787_s3 + $0x18] sm:$0xff] (!%p237_p2)  ;;  %v591_v15 = vld [vmem:[%s786_s2] ss:$0 sm:$0xff] (!%p237_p2)  ;;  %vm455_vm2 = vcmask (!%p237_p2), 130048   ;;  %vm529_vm3 = vcmask (!%p237_p2), 15360  }
   0x8   : > { %643 = vmatpush3.bf16.msra.mxu0 (!%p237_p2), %v642_v4  ;;  %v651_v14 = vpack.c.bf16 (!%p237_p2), %v364_v13, %v363_v12  ;;  %v446_v20 = vld [vmem:[%s789_s5] sm:$0xff] (!%p237_p2)  ;;  %v447_v21 = vld [vmem:[%s789_s5 + $0x8] sm:$0xff] (!%p237_p2) }
   0x9   : > { %644 = vmatprep.subr.bf16.mxu0 (!%p237_p2), %v675_v3  ;;  %649 = vmatpush3.bf16.msra.mxu1 (!%p237_p2), %v648_v9  ;;  %v654_v22 = vpack.c.bf16 (!%p237_p2), %v447_v21, %v446_v20  ;;  %v593_v23 = vld [vmem:[%s788_s4] ss:$0 sm:$0xff] (!%p237_p2) }
   0xa   : > { %650 = vmatprep.subr.bf16.mxu1 (!%p237_p2), %v675_v3  ;;  %v595_v28 = vld [vmem:[%s790_s6] ss:$0 sm:$0xff] (!%p237_p2) }
   0xc   : > { %646 = vmatpush3.bf16.msra.mxu0 (!%p237_p2), %v645_v10 }
   0xd   : > { %s793_s25 = smov (!%p266_p3, %s584_s25), 1  ;;  %653 = vmatprep.subr.bf16.mxu0 %v675_v3  ;;  %652 = vmatpush3.bf16.msra.mxu1 %v651_v14 }
   0xe   : > { %s589_s15 = sshll.u32 %s793_s25, 3 }
   0xf   : > { %s269_s18 = scalar_lea.vmem %s784_s0, %s589_s15  ;;  %s273_s14 = scalar_lea.vmem %s791_s7, %s589_s15 }
  0x10   : > { %v274_v11 = vld [vmem:[%s269_s18] sm:$0xff] }
  0x11   : > { %621 = vmatmul.mubr.msk.f32.vlgmr.msra.gmra.mrb[0].mxu0 %vm286_vm1, %v274_v11 }
  0x12   : > { %638 = vmatprep.mubr.msk.f32.mxu0 %vm676_vm0, %v677_v6  ;;  %655 = vmatpush3.bf16.msra.mxu0 %v654_v22 }
  0xe4   : > { %v356_v16 = vpop.f32.mrb[0].mxu0 }
  0xe5   : > { %v357_v17 = vadd.f32 %v591_v15, %v356_v16  ;;  %v622_v18 = vpop.f32.mrb[1].mxu0 }
  0xe7   : > { %v360_v19 = vmax.f32 %v357_v17, 0.0 }
  0xe9   : > { %632 = vmatmul.mubr.msk.f32.vlgmr.msra.gmra.mrb[0].mxu1 %vm286_vm1, %v360_v19 }
 0x1bc   : > { %v441_v24 = vpop.f32.mrb[0].mxu1 }
 0x1bd   : > { %v442_v25 = vadd.f32 %v593_v23, %v441_v24  ;;  %v633_v26 = vpop.f32.mrb[1].mxu1 }
 0x1bf   : > { %v445_v27 = vmax.f32 %v442_v25, 0.0 }
 0x1c1   : > { %639 = vmatmul.mubr.msk.f32.vlgmr.msra.gmra.mrb[2].mxu0 %vm455_vm2, %v445_v27 }
 0x294   : > { %v525_v29 = vpop.f32.mrb[2].mxu0 }
 0x295   : > { %v526_v30 = vadd.f32 %v595_v28, %v525_v29  ;;  %v640_v31 = vpop.f32.mrb[3].mxu0 }
 0x297   : > { %530 = vst.msk [vmem:[%s273_s14] sm:$0xff] %vm529_vm3, %v526_v30 }
 0x298 PF: > { %s17_s24 = sadd.s32 1, %s673_s24  }
 0x299   : > { %p14_p4 = scmp.ge.s32.totalorder %s17_s24, 4  }
 0x29b   :  { %16 = sbr.rel (!%p14_p4) target bundleno = 1 (0x1), region = 78 }

</bundles_post_ra>
